<compile_context>
chip_gen: v6e
topology: v6e:2x2x1
jax: 0.10.0
libtpu: 0.0.40
codegen_flags: <defaults>
</compile_context>

<pallas_src>
import functools

import jax
import jax.numpy as jnp
from jax.experimental import pallas as pl
from jax.experimental.pallas import tpu as pltpu

LN_EPS = 1e-5                      # nn.LayerNorm default
_SQRT_2_OVER_PI = 0.7978845608028654
_GELU_C = 0.044715


def _ff_kernel(x_ref, g_ref, b_ref, w1_ref, b1_ref, w2_ref, b2_ref, o_ref):
    # One row-tile of the fused feed-forward: LN -> matmul1 -> GELU -> matmul2.
    x = x_ref[...].astype(jnp.float32)                        # (tm, D)

    # LayerNorm over last dim (biased variance, like torch), in f32.
    mean = jnp.mean(x, axis=-1, keepdims=True)
    xc = x - mean
    var = jnp.mean(xc * xc, axis=-1, keepdims=True)
    xn = xc * jax.lax.rsqrt(var + LN_EPS)
    xn = xn * g_ref[...].astype(jnp.float32) + b_ref[...].astype(jnp.float32)

    # Linear(dim -> inner_dim): bf16 operands, f32 accumulation on the MXU.
    h = jnp.dot(xn.astype(jnp.bfloat16), w1_ref[...],
                preferred_element_type=jnp.float32) + b1_ref[...]

    # GELU, tanh approximation: tanh goes to the EUP slot instead of a long
    # f32 erf polynomial on the VALU (binding unit on v6e/v7x otherwise).
    h = 0.5 * h * (1.0 + jnp.tanh(_SQRT_2_OVER_PI * (h + _GELU_C * h * h * h)))

    # Dropout(p=0.0) is identity.

    # Linear(inner_dim -> dim): bf16 operands (activation cast immediately),
    # f32 accumulation on the MXU.
    y = jnp.dot(h.astype(jnp.bfloat16), w2_ref[...],
                preferred_element_type=jnp.float32) + b2_ref[...]

    o_ref[...] = y.astype(o_ref.dtype)


def _round_up(n, m):
    return ((n + m - 1) // m) * m


def _vmem_cap_bytes():
    # 0.75 * physical VMEM when queryable (v7x: 64 MiB/TC -> ~48 MiB cap with
    # headroom for compiler scratch; v5e/v6e: 128 MiB -> 96 MiB). Else 64 MiB.
    try:
        info = pltpu.get_tpu_info()
        cap = getattr(info, "vmem_capacity_bytes", None)
        if cap:
            return int(0.75 * cap)
    except Exception:
        pass
    return 64 * 1024 * 1024


@functools.partial(jax.jit, static_argnames=("tm",))
def feedforward(x, gamma, beta, w1, b1, w2, b2, *, tm=256):
    """x: (B, S, D). Weights: w1 (D, inner), w2 (inner, D) — (in, out) layout.

    Note: for best store throughput D should be a multiple of 128 (true for
    real ViT dims 768/1024); small D (like the 32-dim test) still works but
    uses masked partial stores on the output.
    """
    B, S, D = x.shape
    inner = w1.shape[1]
    N = B * S
    x2 = x.reshape(N, D)

    # Clamp the row tile for tiny inputs (keeps it a multiple of 8).
    tm_eff = max(8, min(tm, _round_up(N, 8)))
    grid_n = pl.cdiv(N, tm_eff)       # partial last block handled by masking

    # bf16 weights: half the VMEM/DMA bytes, bf16 MXU rate (f32 accumulation).
    w1b = w1.astype(jnp.bfloat16)
    w2b = w2.astype(jnp.bfloat16)

    # Explicit VMEM budget (conservative: pipeliner double-buffers even the
    # grid-invariant weight blocks), plus the (tm, inner) intermediates.
    itemsize = jnp.dtype(x.dtype).itemsize
    bytes_needed = (
        2 * tm_eff * D * itemsize            # x tile, double-buffered
        + 2 * tm_eff * D * itemsize          # out tile, double-buffered
        + 2 * 2 * (D * inner + inner * D)    # bf16 W1 + W2, double-buffered
        + 2 * 4 * (3 * D + inner)            # gamma/beta/b1/b2 (f32)
        + tm_eff * inner * (4 + 2)           # f32 h + bf16 h intermediates
        + (4 << 20)                          # headroom
    )
    vmem_limit = int(min(max(bytes_needed, 32 << 20), _vmem_cap_bytes()))

    full2d = lambda shape: pl.BlockSpec(shape, lambda i: (0, 0))

    out = pl.pallas_call(
        _ff_kernel,
        out_shape=jax.ShapeDtypeStruct((N, D), x.dtype),
        grid_spec=pltpu.PrefetchScalarGridSpec(
            num_scalar_prefetch=0,
            grid=(grid_n,),
            in_specs=[
                pl.BlockSpec((tm_eff, D), lambda i: (i, 0)),   # x row tile
                full2d((1, D)),                                # gamma
                full2d((1, D)),                                # beta
                full2d((D, inner)),                            # W1 (bf16)
                full2d((1, inner)),                            # b1
                full2d((inner, D)),                            # W2 (bf16)
                full2d((1, D)),                                # b2
            ],
            out_specs=pl.BlockSpec((tm_eff, D), lambda i: (i, 0)),
        ),
        compiler_params=pltpu.CompilerParams(
            dimension_semantics=("parallel",),
            vmem_limit_bytes=vmem_limit,
        ),
    )(x2, gamma, beta, w1b, b1, w2b, b2)

    return out.reshape(B, S, D)


def _reference(x, gamma, beta, w1, b1, w2, b2):
    # Matches the PyTorch module: LN -> Linear -> exact GELU -> Linear.
    mean = jnp.mean(x, axis=-1, keepdims=True)
    var = jnp.mean((x - mean) ** 2, axis=-1, keepdims=True)
    xn = (x - mean) / jnp.sqrt(var + LN_EPS) * gamma[0] + beta[0]
    h = xn @ w1 + b1[0]
    h = 0.5 * h * (1.0 + jax.lax.erf(h / jnp.sqrt(2.0)))
    return h @ w2 + b2[0]


if __name__ == "__main__":
    # Small shapes consistent with the module: tokens (B, S, dim), mult=4.
    B, S, dim, mult = 2, 8, 32, 4
    inner = dim * mult

    key = jax.random.PRNGKey(0)
    kx, k1, k2, k3, k4 = jax.random.split(key, 5)

    x = jax.random.normal(kx, (B, S, dim), dtype=jnp.float32)

    # Deterministic parameter init (shapes as in the PyTorch module).
    gamma = jnp.ones((1, dim), jnp.float32)
    beta = jnp.zeros((1, dim), jnp.float32)
    # Linear weights stored transposed vs. torch: (in_features, out_features).
    w1 = jax.random.normal(k1, (dim, inner), jnp.float32) * 0.05
    b1 = jax.random.normal(k2, (1, inner), jnp.float32) * 0.01
    w2 = jax.random.normal(k3, (inner, dim), jnp.float32) * 0.05
    b2 = jax.random.normal(k4, (1, dim), jnp.float32) * 0.01

    y = feedforward(x, gamma, beta, w1, b1, w2, b2)
    jax.block_until_ready(y)

    y_ref = _reference(x, gamma, beta, w1, b1, w2, b2)
    # bf16 matmul operands + tanh-approx GELU vs exact-erf f32 reference.
    assert jnp.allclose(y, y_ref, atol=2e-2, rtol=2e-2), "mismatch vs reference"

    print("KERNEL_OK")
</pallas_src>

<mosaic_0001>
module attributes {stable_mosaic.version = 11 : i64} {
  func.func @_ff_kernel(%arg0: i32, %arg1: memref<16x32xf32, #tpu.memory_space<vmem>>, %arg2: memref<1x32xf32, #tpu.memory_space<vmem>>, %arg3: memref<1x32xf32, #tpu.memory_space<vmem>>, %arg4: memref<32x128xbf16, #tpu.memory_space<vmem>>, %arg5: memref<1x128xf32, #tpu.memory_space<vmem>>, %arg6: memref<128x32xbf16, #tpu.memory_space<vmem>>, %arg7: memref<1x32xf32, #tpu.memory_space<vmem>>, %arg8: memref<16x32xf32, #tpu.memory_space<vmem>>) attributes {dimension_semantics = [#tpu.dimension_semantics<parallel>], iteration_bounds = array<i64: 1>, scalar_prefetch = 0 : i64, scratch_operands = 0 : i64, tpu.core_type = #tpu.core_type<tc>, window_params = [{transform_indices = @transform_0, window_bounds = array<i64: 16, 32>}, {pipeline_mode = #tpu.pipeline_mode<synchronous>, transform_indices = @transform_1, window_bounds = array<i64: 1, 32>}, {pipeline_mode = #tpu.pipeline_mode<synchronous>, transform_indices = @transform_2, window_bounds = array<i64: 1, 32>}, {pipeline_mode = #tpu.pipeline_mode<synchronous>, transform_indices = @transform_3, window_bounds = array<i64: 32, 128>}, {pipeline_mode = #tpu.pipeline_mode<synchronous>, transform_indices = @transform_4, window_bounds = array<i64: 1, 128>}, {pipeline_mode = #tpu.pipeline_mode<synchronous>, transform_indices = @transform_5, window_bounds = array<i64: 128, 32>}, {pipeline_mode = #tpu.pipeline_mode<synchronous>, transform_indices = @transform_6, window_bounds = array<i64: 1, 32>}, {transform_indices = @transform_7, window_bounds = array<i64: 16, 32>}]} {
    %c0 = arith.constant 0 : index
    %c0_0 = arith.constant 0 : index
    %0 = vector.load %arg1[%c0, %c0_0] : memref<16x32xf32, #tpu.memory_space<vmem>>, vector<16x32xf32>
    %cst = arith.constant dense<0.000000e+00> : vector<16xf32>
    %1 = vector.multi_reduction <add>, %0, %cst [1] : vector<16x32xf32> to vector<16xf32>
    %2 = vector.shape_cast %1 : vector<16xf32> to vector<16x1xf32>
    %cst_1 = arith.constant 3.200000e+01 : f32
    %3 = vector.broadcast %cst_1 : f32 to vector<16x1xf32>
    %4 = arith.divf %2, %3 : vector<16x1xf32>
    %5 = vector.broadcast %4 : vector<16x1xf32> to vector<16x32xf32>
    %6 = arith.subf %0, %5 : vector<16x32xf32>
    %7 = arith.mulf %6, %6 : vector<16x32xf32>
    %cst_2 = arith.constant dense<0.000000e+00> : vector<16xf32>
    %8 = vector.multi_reduction <add>, %7, %cst_2 [1] : vector<16x32xf32> to vector<16xf32>
    %9 = vector.shape_cast %8 : vector<16xf32> to vector<16x1xf32>
    %cst_3 = arith.constant 3.200000e+01 : f32
    %10 = vector.broadcast %cst_3 : f32 to vector<16x1xf32>
    %11 = arith.divf %9, %10 : vector<16x1xf32>
    %cst_4 = arith.constant 9.99999974E-6 : f32
    %12 = vector.broadcast %cst_4 : f32 to vector<16x1xf32>
    %13 = arith.addf %11, %12 : vector<16x1xf32>
    %14 = math.rsqrt %13 : vector<16x1xf32>
    %15 = vector.broadcast %14 : vector<16x1xf32> to vector<16x32xf32>
    %16 = arith.mulf %6, %15 : vector<16x32xf32>
    %c0_5 = arith.constant 0 : index
    %c0_6 = arith.constant 0 : index
    %17 = vector.load %arg2[%c0_5, %c0_6] : memref<1x32xf32, #tpu.memory_space<vmem>>, vector<1x32xf32>
    %18 = vector.broadcast %17 : vector<1x32xf32> to vector<16x32xf32>
    %19 = arith.mulf %16, %18 : vector<16x32xf32>
    %c0_7 = arith.constant 0 : index
    %c0_8 = arith.constant 0 : index
    %20 = vector.load %arg3[%c0_7, %c0_8] : memref<1x32xf32, #tpu.memory_space<vmem>>, vector<1x32xf32>
    %21 = vector.broadcast %20 : vector<1x32xf32> to vector<16x32xf32>
    %22 = arith.addf %19, %21 : vector<16x32xf32>
    %23 = arith.truncf %22 : vector<16x32xf32> to vector<16x32xbf16>
    %c0_9 = arith.constant 0 : index
    %c0_10 = arith.constant 0 : index
    %24 = vector.load %arg4[%c0_9, %c0_10] : memref<32x128xbf16, #tpu.memory_space<vmem>>, vector<32x128xbf16>
    %cst_11 = arith.constant dense<0.000000e+00> : vector<16x128xf32>
    %25 = tpu.matmul %23, %24, %cst_11 {dimension_numbers = #tpu.dot_dimension_numbers<[1], [0], [0], [1], [0, 0, 1, 1], [], []>} : vector<16x32xbf16>, vector<32x128xbf16>, vector<16x128xf32> -> vector<16x128xf32>
    %c0_12 = arith.constant 0 : index
    %c0_13 = arith.constant 0 : index
    %26 = vector.load %arg5[%c0_12, %c0_13] : memref<1x128xf32, #tpu.memory_space<vmem>>, vector<1x128xf32>
    %27 = vector.broadcast %26 : vector<1x128xf32> to vector<16x128xf32>
    %28 = arith.addf %25, %27 : vector<16x128xf32>
    %cst_14 = arith.constant 5.000000e-01 : f32
    %29 = vector.broadcast %cst_14 : f32 to vector<16x128xf32>
    %30 = arith.mulf %29, %28 : vector<16x128xf32>
    %cst_15 = arith.constant 4.471500e-02 : f32
    %31 = vector.broadcast %cst_15 : f32 to vector<16x128xf32>
    %32 = arith.mulf %31, %28 : vector<16x128xf32>
    %33 = arith.mulf %32, %28 : vector<16x128xf32>
    %34 = arith.mulf %33, %28 : vector<16x128xf32>
    %35 = arith.addf %28, %34 : vector<16x128xf32>
    %cst_16 = arith.constant 0.797884583 : f32
    %36 = vector.broadcast %cst_16 : f32 to vector<16x128xf32>
    %37 = arith.mulf %36, %35 : vector<16x128xf32>
    %38 = math.tanh %37 : vector<16x128xf32>
    %cst_17 = arith.constant 1.000000e+00 : f32
    %39 = vector.broadcast %cst_17 : f32 to vector<16x128xf32>
    %40 = arith.addf %39, %38 : vector<16x128xf32>
    %41 = arith.mulf %30, %40 : vector<16x128xf32>
    %42 = arith.truncf %41 : vector<16x128xf32> to vector<16x128xbf16>
    %c0_18 = arith.constant 0 : index
    %c0_19 = arith.constant 0 : index
    %43 = vector.load %arg6[%c0_18, %c0_19] : memref<128x32xbf16, #tpu.memory_space<vmem>>, vector<128x32xbf16>
    %cst_20 = arith.constant dense<0.000000e+00> : vector<16x32xf32>
    %44 = tpu.matmul %42, %43, %cst_20 {dimension_numbers = #tpu.dot_dimension_numbers<[1], [0], [0], [1], [0, 0, 1, 1], [], []>} : vector<16x128xbf16>, vector<128x32xbf16>, vector<16x32xf32> -> vector<16x32xf32>
    %c0_21 = arith.constant 0 : index
    %c0_22 = arith.constant 0 : index
    %45 = vector.load %arg7[%c0_21, %c0_22] : memref<1x32xf32, #tpu.memory_space<vmem>>, vector<1x32xf32>
    %46 = vector.broadcast %45 : vector<1x32xf32> to vector<16x32xf32>
    %47 = arith.addf %44, %46 : vector<16x32xf32>
    %c0_23 = arith.constant 0 : index
    %c0_24 = arith.constant 0 : index
    %48 = vector.load %arg8[%c0_23, %c0_24] : memref<16x32xf32, #tpu.memory_space<vmem>>, vector<16x32xf32>
    tpu.vector_store %arg8[%c0_23, %c0_24], %47 {strides = array<i32>} : memref<16x32xf32, #tpu.memory_space<vmem>>, vector<16x32xf32>,
    return
  }
  func.func @transform_0(%arg0: i32) -> (i32, i32) {
    %c0_i32 = arith.constant 0 : i32
    %c0_i32_0 = arith.constant 0 : i32
    return %arg0, %c0_i32 : i32, i32
  }
  func.func @transform_1(%arg0: i32) -> (i32, i32) {
    %c0_i32 = arith.constant 0 : i32
    %c0_i32_0 = arith.constant 0 : i32
    %c0_i32_1 = arith.constant 0 : i32
    return %c0_i32, %c0_i32_0 : i32, i32
  }
  func.func @transform_2(%arg0: i32) -> (i32, i32) {
    %c0_i32 = arith.constant 0 : i32
    %c0_i32_0 = arith.constant 0 : i32
    %c0_i32_1 = arith.constant 0 : i32
    return %c0_i32, %c0_i32_0 : i32, i32
  }
  func.func @transform_3(%arg0: i32) -> (i32, i32) {
    %c0_i32 = arith.constant 0 : i32
    %c0_i32_0 = arith.constant 0 : i32
    %c0_i32_1 = arith.constant 0 : i32
    return %c0_i32, %c0_i32_0 : i32, i32
  }
  func.func @transform_4(%arg0: i32) -> (i32, i32) {
    %c0_i32 = arith.constant 0 : i32
    %c0_i32_0 = arith.constant 0 : i32
    %c0_i32_1 = arith.constant 0 : i32
    return %c0_i32, %c0_i32_0 : i32, i32
  }
  func.func @transform_5(%arg0: i32) -> (i32, i32) {
    %c0_i32 = arith.constant 0 : i32
    %c0_i32_0 = arith.constant 0 : i32
    %c0_i32_1 = arith.constant 0 : i32
    return %c0_i32, %c0_i32_0 : i32, i32
  }
  func.func @transform_6(%arg0: i32) -> (i32, i32) {
    %c0_i32 = arith.constant 0 : i32
    %c0_i32_0 = arith.constant 0 : i32
    %c0_i32_1 = arith.constant 0 : i32
    return %c0_i32, %c0_i32_0 : i32, i32
  }
  func.func @transform_7(%arg0: i32) -> (i32, i32) {
    %c0_i32 = arith.constant 0 : i32
    %c0_i32_0 = arith.constant 0 : i32
    return %arg0, %c0_i32 : i32, i32
  }
}

</mosaic_0001>

<bundles_post_ra>
// kernel: feedforward.1
= control target key start
LH: loop header
LB: loop body
LE: loop exit
PB: predicated region body
PF: predicated region fallthrough
CT: control target
= control target key end

     0   :  { %vm30_vm0 = vcmask 261120   ;;  %s496_s0 = inlined_call_operand.vmem [shape: f32[16,32], index: 0, kind: input, shape index: {}]   ;;  %s497_s1 = inlined_call_operand.vmem [shape: f32[1,32], index: 1, kind: input, shape index: {}]   ;;  %s498_s2 = inlined_call_operand.vmem [shape: f32[1,32], index: 2, kind: input, shape index: {}]   ;;  %s499_s3 = inlined_call_operand.vmem [shape: bf16[32,128], index: 3, kind: input, shape index: {}]   ;;  %s500_s4 = inlined_call_operand.vmem [shape: f32[1,128], index: 4, kind: input, shape index: {}]   ;;  %s501_s5 = inlined_call_operand.vmem [shape: bf16[128,32], index: 5, kind: input, shape index: {}]   ;;  %s502_s6 = inlined_call_operand.vmem [shape: f32[1,32], index: 6, kind: input, shape index: {}]   ;;  %s503_s7 = inlined_call_operand.hbm [shape: f32[16,32], index: 7, kind: output, shape index: {}]  }
   0x1   :  { %v28_v0 = vld [vmem:[%s496_s0] sm:$0xff]  ;;  %v29_v1 = vld [vmem:[%s496_s0 + $0x8] sm:$0xff] }
   0x2   :  { %v31_v2 = vsel %vm30_vm0, %v28_v0, 0.0  ;;  %v34_v3 = vsel %vm30_vm0, %v29_v1, 0.0 }
   0x3   :  { %32 = vadd.xlane.f32.xlu0 %v31_v2 }
   0x7   :  { %35 = vadd.xlane.f32.xlu0 %v34_v3 }
   0x8   :  { %12 = vsyncpa [#allocation3], 0  ;;  %v353_v14 = vld [vmem:[%s499_s3 + $0x8] sm:$0xff]   ;;  %v393_v15 = vmov 0.0   ;;  %vm394_vm1 = vmmov 0   ;;  %v354_v16 = vld [vmem:[%s499_s3] sm:$0xff]  }
   0x9   :  { %320 = vmatprep.subr.bf16.mxu0 %v393_v15  ;;  %324 = vmatprep.mubr.msk.bf16.mxu0 %vm394_vm1, %v393_v15  ;;  %v293_v25 = vld [vmem:[%s497_s1] ss:$0 sm:$0xff]  ;;  %v355_v34 = vld [vmem:[%s501_s5 + $0x38] sm:$0xff]   ;;  %v356_v35 = vld [vmem:[%s501_s5 + $0x30] sm:$0xff]   ;;  %s395_s27 = smov [#allocation2]  }
   0xa   :  { %321 = vmatpush3.bf16.msra.mxu0 %v353_v14  ;;  %328 = vmatprep.subr.bf16.mxu1 %v393_v15  ;;  %v294_v29 = vld [vmem:[%s498_s2] ss:$0 sm:$0xff]  ;;  %v357_v36 = vld [vmem:[%s501_s5 + $0x28] sm:$0xff]   ;;  %v359_v38 = vld [vmem:[%s501_s5 + $0x18] sm:$0xff]   ;;  %s282_s0 = sshll.u32 %s395_s27, 4  ;;  %s283_s0 = int_to_ptr.vmem [resolvable:$true] %s282_s0 }
   0xb   :  { %322 = vmatprep.subr.bf16.mxu0 %v393_v15  ;;  %344 = vmatprep.mubr.msk.bf16.mxu1 %vm394_vm1, %v393_v15  ;;  %v358_v37 = vld [vmem:[%s501_s5 + $0x20] sm:$0xff]   ;;  %v360_v39 = vld [vmem:[%s501_s5 + $0x10] sm:$0xff]   ;;  %v361_v40 = vld [vmem:[%s501_s5 + $0x8] sm:$0xff]   ;;  %s371_s28 = scalar_lea.vmem %s283_s0, 256  ;;  %p376_p1 = scmp.lt.s32.totalorder %s283_s0, %s283_s0 }
   0xc   :  { %329 = vmatpush3.bf16.msra.mxu1 %v355_v34  ;;  %v362_v41 = vld [vmem:[%s501_s5] sm:$0xff]   ;;  %p372_p0 = scmp.ne.s32.totalorder %s283_s0, %s371_s28  ;;  %p377_p2 = scmp.lt.s32.totalorder %s371_s28, %s371_s28 }
   0xd   :  { %330 = vmatprep.subr.bf16.mxu1 %v393_v15  ;;  %v295_v42 = vld [vmem:[%s500_s4] ss:$0 sm:$0xff] }
   0xe   :  { %323 = vmatpush3.bf16.msra.mxu0 %v354_v16  ;;  %p378_p3 = por %p377_p2, %p376_p1 }
  0x10   :  { %331 = vmatpush3.bf16.msra.mxu1 %v356_v35  ;;  %p379_p4 = pnand %p378_p3, %p372_p0 }
  0x11   :  { %332 = vmatprep.subr.bf16.mxu1 %v393_v15 }
  0x14   :  { %333 = vmatpush3.bf16.msra.mxu1 %v357_v36 }
  0x15   :  { %334 = vmatprep.subr.bf16.mxu1 %v393_v15 }
  0x18   :  { %335 = vmatpush3.bf16.msra.mxu1 %v358_v37 }
  0x19   :  { %336 = vmatprep.subr.bf16.mxu1 %v393_v15 }
  0x1c   :  { %337 = vmatpush3.bf16.msra.mxu1 %v359_v38 }
  0x1d   :  { %338 = vmatprep.subr.bf16.mxu1 %v393_v15 }
  0x20   :  { %339 = vmatpush3.bf16.msra.mxu1 %v360_v39 }
  0x21   :  { %340 = vmatprep.subr.bf16.mxu1 %v393_v15 }
  0x24   :  { %341 = vmatpush3.bf16.msra.mxu1 %v361_v40 }
  0x25   :  { %342 = vmatprep.subr.bf16.mxu1 %v393_v15 }
  0x28   :  { %343 = vmatpush3.bf16.msra.mxu1 %v362_v41 }
  0x8c   :  { %v33_v4 = vpop.xlane.xlu0 %32 }
  0x8d   :  { %v38_v5 = vmul.f32 0.03125, %v33_v4  ;;  %v299_v4 = vld [vmem:[%s502_s6] ss:$0 sm:$0xff] }
  0x8f   :  { %v40_v6 = vsub.f32 %v28_v0, %v38_v5 }
  0x90   :  { %v36_v7 = vpop.xlane.xlu0 %35 }
  0x91   :  { %v39_v8 = vmul.f32 0.03125, %v36_v7  ;;  %v42_v9 = vmul.f32 %v40_v6, %v40_v6 }
  0x93   :  { %v41_v10 = vsub.f32 %v29_v1, %v39_v8  ;;  %v44_v11 = vsel %vm30_vm0, %v42_v9, 0.0 }
  0x94   :  { %45 = vadd.xlane.f32.xlu1 %v44_v11 }
  0x95   :  { %v43_v12 = vmul.f32 %v41_v10, %v41_v10 }
  0x97   :  { %v47_v13 = vsel %vm30_vm0, %v43_v12, 0.0 }
  0x98   :  { %48 = vadd.xlane.f32.xlu1 %v47_v13 }
 0x11d   :  { %v46_v17 = vpop.xlane.xlu1 %45 }
 0x11e   :  { %v50_v18 = vmul.f32 0.03125, %v46_v17 }
 0x120   :  { %v52_v19 = vadd.f32 1e-05, %v50_v18 }
 0x121   :  { %v49_v20 = vpop.xlane.xlu1 %48 }
 0x122   :  { %363 = vrsqrt.f32 %v52_v19  ;;  %v51_v21 = vmul.f32 0.03125, %v49_v20 }
 0x124   :  { %v53_v22 = vadd.f32 1e-05, %v51_v21 }
 0x126   :  { %365 = vrsqrt.f32 %v53_v22 }
 0x12f   :  { %v364_v23 = vpop.eup %363 }
 0x130   :  { %v56_v24 = vmul.f32 %v364_v23, %v40_v6 }
 0x132   :  { %v65_v28 = vmul.f32 %v293_v25, %v56_v24 }
 0x133   :  { %v366_v26 = vpop.eup %365 }
 0x134   :  { %v57_v27 = vmul.f32 %v366_v26, %v41_v10  ;;  %v74_v31 = vadd.f32 %v294_v29, %v65_v28 }
 0x136   :  { %v66_v30 = vmul.f32 %v293_v25, %v57_v27 }
 0x138   :  { %v75_v32 = vadd.f32 %v294_v29, %v66_v30 }
 0x13a   :  { %v76_v33 = vpack.c.bf16 %v75_v32, %v74_v31 }
 0x13c   :  { %325 = vmatmul.mubr.msk.bf16.vlgmr.msra.gmra.mxu0 %vm30_vm0, %v76_v33 }
 0x1fc   :  { %v137_v43 = vpop.f32.mrf.mxu0 }
 0x1fd   :  { %v138_v44 = vadd.f32 %v295_v42, %v137_v43 }
 0x1fe   :  { %v326_v45 = vpop.f32.mrf.mxu0 }
 0x1ff   :  { %v146_v46 = vmul.f32 0.044715, %v138_v44  ;;  %v144_v62 = vmul.f32 0.5, %v138_v44 }
 0x200   :  { %v140_v47 = vpop.f32.mrf.mxu0 }
 0x201   :  { %v148_v48 = vmul.f32 %v146_v46, %v138_v44  ;;  %v141_v49 = vadd.f32 %v295_v42, %v140_v47 }
 0x202   :  { %v327_v50 = vpop.f32.mrf.mxu0 }
 0x203   :  { %v150_v51 = vmul.f32 %v148_v48, %v138_v44  ;;  %v147_v52 = vmul.f32 0.044715, %v141_v49  ;;  %v145_v63 = vmul.f32 0.5, %v141_v49 }
 0x205   :  { %v149_v53 = vmul.f32 %v147_v52, %v141_v49  ;;  %v152_v54 = vadd.f32 %v150_v51, %v138_v44 }
 0x207   :  { %v151_v55 = vmul.f32 %v149_v53, %v141_v49  ;;  %v154_v56 = vmul.f32 0.7978846, %v152_v54 }
 0x209   :  { %v153_v57 = vadd.f32 %v151_v55, %v141_v49  ;;  %367 = vtanh.f32 %v154_v56 }
 0x20b   :  { %v155_v58 = vmul.f32 0.7978846, %v153_v57 }
 0x20d   :  { %369 = vtanh.f32 %v155_v58 }
 0x216   :  { %v368_v59 = vpop.eup %367 }
 0x217   :  { %v158_v60 = vadd.f32 1.0, %v368_v59 }
 0x219   :  { %v160_v1 = vmul.f32 %v158_v60, %v144_v62 }
 0x21a   :  { %v370_v61 = vpop.eup %369 }
 0x21b   :  { %v159_v0 = vadd.f32 1.0, %v370_v61 }
 0x21d   :  { %v161_v2 = vmul.f32 %v159_v0, %v145_v63 }
 0x21f   :  { %v162_v3 = vpack.c.bf16 %v161_v2, %v160_v1 }
 0x221   :  { %345 = vmatmul.mubr.bf16.vlgmr.msra.gmra.mxu1 %v162_v3 }
 0x2e1   :  { %v268_v5 = vpop.f32.mrf.mxu1 }
 0x2e2   :  { %v269_v6 = vadd.f32 %v299_v4, %v268_v5 }
 0x2e3   :  { %v346_v7 = vpop.f32.mrf.mxu1 }
 0x2e4   :  { %275 = vst.msk [vmem:[#allocation2] sm:$0xff] %vm30_vm0, %v269_v6 }
 0x2e5   :  { %v271_v8 = vpop.f32.mrf.mxu1 }
 0x2e6   :  { %v272_v9 = vadd.f32 %v299_v4, %v271_v8 }
 0x2e7   :  { %v347_v10 = vpop.f32.mrf.mxu1 }
 0x2e8   :  { %276 = vst.msk [vmem:[#allocation2 + $0x8] sm:$0xff] %vm30_vm0, %v272_v9 }
 0x2e9   :  { %382 = shalt.err (!%p379_p4)
}
 0x2ea   :  { %s396_s6 = smov 128   ;;  %s397_s29 = smov 8  }
 0x2eb   :  { %288 = dma.vmem_to_hbm [thread:$0]  %s283_s0, 256, %s503_s7, [#allocation3], %s396_s6, %s396_s6, %s397_s29  }
 0x2ec   :  { %391 = dma.done.wait [#allocation3], 256  }
 0x2ed   :  { %392 = vsyncadd [#allocation3], 4294967040 }
 0x2ee   :  { %292 = vsyncpa [#allocation3], 1 }

</bundles_post_ra>
